<compile_context>
chip_gen: v6e
topology: v6e:2x2x1
jax: 0.10.0
libtpu: 0.0.40
codegen_flags: <defaults>
</compile_context>

<pallas_src>
import jax
import jax.numpy as jnp
from jax.experimental import pallas as pl
from jax.experimental.pallas import tpu as pltpu


LANE = 128
_WIDTHS = (1024, 512, 256, 128)          # preferred lane-dense slab widths
_TARGET_BLOCK_BYTES = 2 * 1024 * 1024    # ~2 MiB per block amortizes ~0.35us/step
_SUBLANE_PACK = 32                       # row multiple safe for f32/bf16/int8 packing


def _identity_kernel(x_ref, o_ref):
    # Whole-tile load/store — pure VMEM pass-through.
    o_ref[...] = x_ref[...]


def _as_slab(x: jax.Array) -> jax.Array:
    """Reshape (view, no data movement) into a 2-D lane-dense slab."""
    total = x.size
    if total % LANE == 0:
        for w in _WIDTHS:
            if total % w == 0:
                return x.reshape(-1, w)
    # Non-128-multiple total: keep the original last dim as the lane axis and
    # let Pallas handle the full-width (== array dim) block; no jnp.pad pass.
    # TODO(synk): if the (non-128-multiple) last dim were enormous, the column
    #             axis would also need tiling; not needed for these shapes.
    if x.ndim >= 2:
        return x.reshape(-1, x.shape[-1])
    return x.reshape(1, total)


def _copy_2d(flat: jax.Array) -> jax.Array:
    """Tiled, double-buffered identity copy of a 2-D slab (VMEM-safe on v5e/v6e/v7x)."""
    rows, cols = flat.shape
    bytes_per_row = max(1, cols * flat.dtype.itemsize)
    target_rows = max(1, _TARGET_BLOCK_BYTES // bytes_per_row)
    if rows <= target_rows:
        # Single block covering the whole slab (block dims == array dims is
        # always a legal block shape); grid has exactly one step.
        block_rows = rows
    else:
        block_rows = max(_SUBLANE_PACK,
                         (target_rows // _SUBLANE_PACK) * _SUBLANE_PACK)
        block_rows = min(block_rows, rows)

    grid = (pl.cdiv(rows, block_rows),)
    return pl.pallas_call(
        _identity_kernel,
        out_shape=jax.ShapeDtypeStruct((rows, cols), flat.dtype),
        grid=grid,
        in_specs=[pl.BlockSpec((block_rows, cols), lambda i: (i, 0))],
        out_specs=pl.BlockSpec((block_rows, cols), lambda i: (i, 0)),
        compiler_params=pltpu.CompilerParams(
            dimension_semantics=("parallel",),
        ),
    )(flat)


@jax.jit
def model_forward(x: jax.Array) -> jax.Array:
    """Pallas equivalent of Model.forward (identity pass-through of input)."""
    if x.size == 0:
        return x
    orig_shape = x.shape
    out = _copy_2d(_as_slab(x))
    return out.reshape(orig_shape)


if __name__ == "__main__":
    key = jax.random.PRNGKey(0)
    # Small NCHW input consistent with a generic image-like module input.
    x = jax.random.normal(key, (2, 4, 16, 16), dtype=jnp.float32)
    y = jax.block_until_ready(model_forward(x))
    assert y.shape == x.shape
    assert y.dtype == x.dtype
    assert bool(jnp.array_equal(y, x))

    # Also exercise the non-128-multiple path (no padding, full-width block).
    x2 = jax.random.normal(jax.random.PRNGKey(0), (3, 5, 7), dtype=jnp.float32)
    y2 = jax.block_until_ready(model_forward(x2))
    assert y2.shape == x2.shape
    assert bool(jnp.array_equal(y2, x2))

    print("KERNEL_OK")
</pallas_src>

<mosaic_0001>
module attributes {stable_mosaic.version = 11 : i64} {
  func.func @_identity_kernel(%arg0: i32, %arg1: memref<2x1024xf32, #tpu.memory_space<vmem>>, %arg2: memref<2x1024xf32, #tpu.memory_space<vmem>>) attributes {dimension_semantics = [#tpu.dimension_semantics<parallel>], iteration_bounds = array<i64: 1>, scalar_prefetch = 0 : i64, scratch_operands = 0 : i64, tpu.core_type = #tpu.core_type<tc>, window_params = [{transform_indices = @transform_0, window_bounds = array<i64: 2, 1024>}, {transform_indices = @transform_1, window_bounds = array<i64: 2, 1024>}]} {
    %c0 = arith.constant 0 : index
    %c0_0 = arith.constant 0 : index
    %0 = vector.load %arg1[%c0, %c0_0] : memref<2x1024xf32, #tpu.memory_space<vmem>>, vector<2x1024xf32>
    %c0_1 = arith.constant 0 : index
    %c0_2 = arith.constant 0 : index
    %1 = vector.load %arg2[%c0_1, %c0_2] : memref<2x1024xf32, #tpu.memory_space<vmem>>, vector<2x1024xf32>
    tpu.vector_store %arg2[%c0_1, %c0_2], %0 {strides = array<i32>} : memref<2x1024xf32, #tpu.memory_space<vmem>>, vector<2x1024xf32>,
    return
  }
  func.func @transform_0(%arg0: i32) -> (i32, i32) {
    %c0_i32 = arith.constant 0 : i32
    %c0_i32_0 = arith.constant 0 : i32
    return %arg0, %c0_i32 : i32, i32
  }
  func.func @transform_1(%arg0: i32) -> (i32, i32) {
    %c0_i32 = arith.constant 0 : i32
    %c0_i32_0 = arith.constant 0 : i32
    return %arg0, %c0_i32 : i32, i32
  }
}

</mosaic_0001>

<bundles_post_ra>
// kernel: model_forward.1
= control target key start
LH: loop header
LB: loop body
LE: loop exit
PB: predicated region body
PF: predicated region fallthrough
CT: control target
= control target key end

     0   :  { %s38_s0 = inlined_call_operand.vmem [shape: f32[2,1024], index: 0, kind: input, shape index: {}]   ;;  %s39_s1 = inlined_call_operand.vmem [shape: f32[2,1024], index: 1, kind: output, shape index: {}]  }
   0x1   :  { %v8_v0 = vld [vmem:[%s38_s0] sm:$0xff]  ;;  %v9_v1 = vld [vmem:[%s38_s0 + $0x8] sm:$0xff] }
   0x2   :  { %10 = vst [vmem:[%s39_s1] sm:$0xff] %v8_v0  ;;  %11 = vst [vmem:[%s39_s1 + $0x8] sm:$0xff] %v9_v1 }

</bundles_post_ra>
